<compile_context>
chip_gen: v7x
topology: tpu7x:2x2x1
jax: 0.10.0
libtpu: 0.0.40
codegen_flags: <defaults>
</compile_context>

<pallas_src>
import functools
import math

import jax
import jax.numpy as jnp
from jax import lax
from jax.experimental import pallas as pl
from jax.experimental.pallas import tpu as pltpu


# ----------------------------------------------------------------------------
# Pallas kernel
# ----------------------------------------------------------------------------
def _embed_connector_kernel(tok_ref, tw_ref, pe_ref, o_ref):
    """out[tm, Dp] = onehot(tok) @ TW + PE'   (single MXU matmul + VPU add).

    TW  = table @ concat(sqrt(d1)*W1, sqrt(d2)*W2, 0-pad)   (Vp, Dp)
    PE' = concat(PE@W1+b1, PE@W2+b2, 0-pad), pre-tiled      (tm, Dp)
    """
    tm = o_ref.shape[0]
    v_pad = tw_ref.shape[0]

    tok = tok_ref[...]                                            # (tm, 1) int32
    onehot = (lax.broadcasted_iota(jnp.int32, (tm, v_pad), 1) == tok)
    acc = jnp.dot(onehot.astype(jnp.float32), tw_ref[...],
                  preferred_element_type=jnp.float32)             # (tm, Dp)
    o_ref[...] = (acc + pe_ref[...]).astype(o_ref.dtype)


def _pick_tile_rows(m, seq_len, target=512):
    """Rows per block: multiple of seq_len (PE period) and 8 (sublane), divides M."""
    unit = (seq_len * 8) // math.gcd(seq_len, 8)
    if m % unit != 0:
        return m                       # fall back to a single full-extent block
    tm = max(unit, (min(target, m) // unit) * unit)
    while m % tm != 0:
        tm -= unit
    return tm


def embed_connector(tok_flat, fused_table, pe_proj, *, target_rows=512):
    """tok_flat: (M,) int32, fused_table: (Vp, Dp), pe_proj: (S, Dp) -> (M, Dp) f32."""
    m = tok_flat.shape[0]
    v_pad, d_pad = fused_table.shape
    s = pe_proj.shape[0]

    tm = _pick_tile_rows(m, s, target_rows)
    grid = (m // tm,)

    # Pre-tile the PE projection to one block's worth of rows (tiny — read once,
    # resident via constant index map). Avoids any in-kernel reshape/broadcast.
    pe_tile = pe_proj if tm == s else jnp.tile(pe_proj, (tm // s, 1))

    return pl.pallas_call(
        _embed_connector_kernel,
        out_shape=jax.ShapeDtypeStruct((m, d_pad), jnp.float32),
        grid=grid,
        in_specs=[
            pl.BlockSpec((tm, 1), lambda i: (i, 0)),         # tokens: per tile
            pl.BlockSpec((v_pad, d_pad), lambda i: (0, 0)),  # fused table: resident
            pl.BlockSpec((tm, d_pad), lambda i: (0, 0)),     # PE projection: resident
        ],
        out_specs=pl.BlockSpec((tm, d_pad), lambda i: (i, 0)),
        compiler_params=pltpu.CompilerParams(
            dimension_semantics=("parallel",)),
    )(tok_flat.reshape(m, 1).astype(jnp.int32), fused_table, pe_tile)


# ----------------------------------------------------------------------------
# Parameter prep (one-time algebraic folding) + forward glue
# ----------------------------------------------------------------------------
def sinusoidal_pe(seq_len, d_model):
    pos = jnp.arange(seq_len, dtype=jnp.float32)[:, None]
    div = jnp.exp(jnp.arange(0, d_model, 2, dtype=jnp.float32)
                  * (-math.log(10000.0) / d_model))
    pe = jnp.zeros((seq_len, d_model), dtype=jnp.float32)
    pe = pe.at[:, 0::2].set(jnp.sin(pos * div))
    pe = pe.at[:, 1::2].set(jnp.cos(pos * div))
    return pe


def build_fused_connector_params(embed_table, pos_enc, params, paths):
    """Fold the embedding scale into W, fold the embedding TABLE into the
    projection, and pre-project PE + bias. All connectors are concatenated
    along D and padded to a lane-dense multiple of 128 (and vocab rows to a
    sublane multiple of 8)."""
    w_blocks, pe_blocks, slices = [], [], {}
    off = 0
    for name, w_key, b_key in (("structure", "w_struct", "b_struct"),
                               ("substructure", "w_substruct", "b_substruct")):
        if name not in paths:
            continue
        w, b = params[w_key], params[b_key]
        d = w.shape[1]
        scale = math.sqrt(float(d))        # fwd_fn receives the target model's d_model
        w_blocks.append(scale * w)         # (E, D)
        pe_blocks.append(pos_enc @ w + b)  # (S, D): PE @ W + bias (PE is not scaled)
        slices[name] = (off, off + d)
        off += d

    w_cat = jnp.concatenate(w_blocks, axis=1)    # (E, Dt)
    pe_cat = jnp.concatenate(pe_blocks, axis=1)  # (S, Dt)
    d_total = off
    d_pad = max(128, ((d_total + 127) // 128) * 128)

    v, _ = embed_table.shape
    v_pad = ((v + 7) // 8) * 8

    # Fused token table: gather + scaled projection folded into one (Vp, Dp) slab.
    tw = jnp.zeros((v_pad, d_pad), jnp.float32)
    tw = tw.at[:v, :d_total].set(embed_table @ w_cat)
    pe_proj = jnp.zeros((pe_cat.shape[0], d_pad), jnp.float32).at[:, :d_total].set(pe_cat)
    return tw, pe_proj, slices


@functools.partial(jax.jit, static_argnames="eval_paths")
def multitask_forward(src_tokens, params, eval_paths=("structure", "substructure")):
    """Replicates MultiTaskModel.forward up to (but not including) the external
    sub-model evaluation: returns (embedded, key_pad_mask) per requested path."""
    b, s = src_tokens.shape
    paths = [p for p in ("structure", "substructure") if p in eval_paths]
    outputs = {"structure": None, "substructure": None}
    if not paths:
        return outputs["structure"], outputs["substructure"]

    fused_table, pe_proj, slices = build_fused_connector_params(
        params["embed_table"], params["pos_enc"], params, paths)

    tok_flat = src_tokens.reshape(b * s)
    fused = embed_connector(tok_flat, fused_table, pe_proj)

    # Pad mask: a few integer compares — plain JAX, computed once, reused.
    key_pad_mask = (src_tokens == params["pad_token"])

    for name in paths:
        lo, hi = slices[name]
        emb = fused[:, lo:hi].reshape(b, s, hi - lo)
        outputs[name] = (emb, key_pad_mask)

    return outputs["structure"], outputs["substructure"]


# ----------------------------------------------------------------------------
# Main
# ----------------------------------------------------------------------------
if __name__ == "__main__":
    key = jax.random.PRNGKey(0)
    k_tok, k_emb, k_ws, k_bs, k_wu, k_bu = jax.random.split(key, 6)

    # Small synthetic shapes consistent with the module:
    B, S = 2, 8                 # batch, sequence length
    vocab = 20                  # src vocabulary
    pad_token = 0               # src_pad_token of the sub-models
    src_embed_dim = 32          # src_embed.d_model
    structure_dim = 64          # structure_model.network.d_model
    substructure_dim = 48       # substructure_model.network.d_model

    src_tokens = jax.random.randint(k_tok, (B, S), 0, vocab, dtype=jnp.int32)

    params = {
        "pad_token": pad_token,
        "embed_table": 0.02 * jax.random.normal(
            k_emb, (vocab, src_embed_dim), dtype=jnp.float32),
        "pos_enc": sinusoidal_pe(S, src_embed_dim),
        # nn.Linear(src_embed_dim, structure_dim): stored transposed (E, D)
        "w_struct": (jax.random.uniform(k_ws, (src_embed_dim, structure_dim),
                                        dtype=jnp.float32, minval=-1.0, maxval=1.0)
                     / math.sqrt(src_embed_dim)),
        "b_struct": (jax.random.uniform(k_bs, (1, structure_dim),
                                        dtype=jnp.float32, minval=-1.0, maxval=1.0)
                     / math.sqrt(src_embed_dim)),
        # nn.Linear(src_embed_dim, substructure_dim)
        "w_substruct": (jax.random.uniform(k_wu, (src_embed_dim, substructure_dim),
                                           dtype=jnp.float32, minval=-1.0, maxval=1.0)
                        / math.sqrt(src_embed_dim)),
        "b_substruct": (jax.random.uniform(k_bu, (1, substructure_dim),
                                           dtype=jnp.float32, minval=-1.0, maxval=1.0)
                        / math.sqrt(src_embed_dim)),
    }

    (struct_emb, struct_mask), (substruct_emb, substruct_mask) = multitask_forward(
        src_tokens, params, eval_paths=("structure", "substructure"))
    jax.block_until_ready((struct_emb, struct_mask, substruct_emb, substruct_mask))

    # Sanity: shapes must match the module's conventions.
    assert struct_emb.shape == (B, S, structure_dim)
    assert substruct_emb.shape == (B, S, substructure_dim)
    assert struct_mask.shape == (B, S) and substruct_mask.shape == (B, S)

    # Cross-check the fused kernel against plain JAX (pre-folding formulation).
    emb = params["embed_table"][src_tokens]
    pe = params["pos_enc"][None, :, :]
    ref_struct = ((emb * math.sqrt(structure_dim) + pe)
                  @ params["w_struct"] + params["b_struct"][0])
    ref_sub = ((emb * math.sqrt(substructure_dim) + pe)
               @ params["w_substruct"] + params["b_substruct"][0])
    assert jnp.allclose(struct_emb, ref_struct, atol=1e-4, rtol=1e-4)
    assert jnp.allclose(substruct_emb, ref_sub, atol=1e-4, rtol=1e-4)
    assert jnp.array_equal(struct_mask, src_tokens == pad_token)
    assert jnp.array_equal(substruct_mask, src_tokens == pad_token)

    # Single-path evaluation still works (kernel built for that path only).
    (s_only_emb, s_only_mask), none_out = multitask_forward(
        src_tokens, params, eval_paths=("structure",))
    jax.block_until_ready((s_only_emb, s_only_mask))
    assert none_out is None
    assert jnp.allclose(s_only_emb, ref_struct, atol=1e-4, rtol=1e-4)

    print("KERNEL_OK")
</pallas_src>

<mosaic_0001>
module attributes {stable_mosaic.version = 11 : i64} {
  func.func @_embed_connector_kernel(%arg0: i32, %arg1: memref<16x1xi32, #tpu.memory_space<vmem>>, %arg2: memref<24x128xf32, #tpu.memory_space<vmem>>, %arg3: memref<16x128xf32, #tpu.memory_space<vmem>>, %arg4: memref<16x128xf32, #tpu.memory_space<vmem>>) attributes {dimension_semantics = [#tpu.dimension_semantics<parallel>], iteration_bounds = array<i64: 1>, scalar_prefetch = 0 : i64, scratch_operands = 0 : i64, tpu.core_type = #tpu.core_type<tc>, window_params = [{transform_indices = @transform_0, window_bounds = array<i64: 16, 1>}, {pipeline_mode = #tpu.pipeline_mode<synchronous>, transform_indices = @transform_1, window_bounds = array<i64: 24, 128>}, {pipeline_mode = #tpu.pipeline_mode<synchronous>, transform_indices = @transform_2, window_bounds = array<i64: 16, 128>}, {transform_indices = @transform_3, window_bounds = array<i64: 16, 128>}]} {
    %c0 = arith.constant 0 : index
    %c0_0 = arith.constant 0 : index
    %0 = vector.load %arg1[%c0, %c0_0] : memref<16x1xi32, #tpu.memory_space<vmem>>, vector<16x1xi32>
    %1 = tpu.iota {dimensions = array<i32: 1>} : vector<16x24xi32>
    %2 = vector.broadcast %0 : vector<16x1xi32> to vector<16x24xi32>
    %3 = arith.cmpi eq, %1, %2 : vector<16x24xi32>
    %4 = arith.extui %3 : vector<16x24xi1> to vector<16x24xi32>
    %5 = arith.sitofp %4 : vector<16x24xi32> to vector<16x24xf32>
    %c0_1 = arith.constant 0 : index
    %c0_2 = arith.constant 0 : index
    %6 = vector.load %arg2[%c0_1, %c0_2] : memref<24x128xf32, #tpu.memory_space<vmem>>, vector<24x128xf32>
    %cst = arith.constant dense<0.000000e+00> : vector<16x128xf32>
    %7 = tpu.matmul %5, %6, %cst {dimension_numbers = #tpu.dot_dimension_numbers<[1], [0], [0], [1], [0, 0, 1, 1], [], []>} : vector<16x24xf32>, vector<24x128xf32>, vector<16x128xf32> -> vector<16x128xf32>
    %c0_3 = arith.constant 0 : index
    %c0_4 = arith.constant 0 : index
    %8 = vector.load %arg3[%c0_3, %c0_4] : memref<16x128xf32, #tpu.memory_space<vmem>>, vector<16x128xf32>
    %9 = arith.addf %7, %8 : vector<16x128xf32>
    %c0_5 = arith.constant 0 : index
    %c0_6 = arith.constant 0 : index
    %10 = vector.load %arg4[%c0_5, %c0_6] : memref<16x128xf32, #tpu.memory_space<vmem>>, vector<16x128xf32>
    tpu.vector_store %arg4[%c0_5, %c0_6], %9 {strides = array<i32>} : memref<16x128xf32, #tpu.memory_space<vmem>>, vector<16x128xf32>,
    return
  }
  func.func @transform_0(%arg0: i32) -> (i32, i32) {
    %c0_i32 = arith.constant 0 : i32
    %c0_i32_0 = arith.constant 0 : i32
    return %arg0, %c0_i32 : i32, i32
  }
  func.func @transform_1(%arg0: i32) -> (i32, i32) {
    %c0_i32 = arith.constant 0 : i32
    %c0_i32_0 = arith.constant 0 : i32
    %c0_i32_1 = arith.constant 0 : i32
    return %c0_i32, %c0_i32_0 : i32, i32
  }
  func.func @transform_2(%arg0: i32) -> (i32, i32) {
    %c0_i32 = arith.constant 0 : i32
    %c0_i32_0 = arith.constant 0 : i32
    %c0_i32_1 = arith.constant 0 : i32
    return %c0_i32, %c0_i32_0 : i32, i32
  }
  func.func @transform_3(%arg0: i32) -> (i32, i32) {
    %c0_i32 = arith.constant 0 : i32
    %c0_i32_0 = arith.constant 0 : i32
    return %arg0, %c0_i32 : i32, i32
  }
}

</mosaic_0001>

<bundles_post_ra>
// kernel: multitask_forward.1
= control target key start
LH: loop header
LB: loop body
LE: loop exit
PB: predicated region body
PF: predicated region fallthrough
CT: control target
= control target key end

     0   :  { %v148_v0 = vmov 0   ;;  %v16_v7 = vlaneseq  ;;  %vm35_vm0 = vcmask 195584   ;;  %v149_v10 = vmov 0.0   ;;  %s197_s0 = inlined_call_operand.vmem [shape: s32[16,1], index: 0, kind: input, shape index: {}]   ;;  %s198_s1 = inlined_call_operand.vmem [shape: f32[24,128], index: 1, kind: input, shape index: {}]   ;;  %s199_s2 = inlined_call_operand.vmem [shape: f32[16,128], index: 2, kind: input, shape index: {}]   ;;  %s200_s3 = inlined_call_operand.vmem [shape: f32[16,128], index: 3, kind: output, shape index: {}]  }
   0x1   :  { %147 = vset.pattern.permute.xlu0 %v148_v0  ;;  %v14_v1 = vld [vmem:[%s197_s0] sm:$0xff]  ;;  %v31_v3 = vld [vmem:[%s198_s1 + $0x8] sm:$0xff]  ;;  %v32_v6 = vld [vmem:[%s198_s1 + $0x10] sm:$0xff] }
   0x2   :  { %v30_v2 = vld [vmem:[%s198_s1] sm:$0xff]  ;;  %19 = vperm.xlu0 %147, %v14_v1   ;;  %v15_v4 = vld [vmem:[%s197_s0 + $0x8] sm:$0xff]  ;;  %v17_v8 = vand.u32 127, %v16_v7 }
   0x3   :  { %v141_v5 = vpack.c.bf16 %v31_v3, %v30_v2  ;;  %v34_v14 = vld [vmem:[%s199_s2 + $0x8] sm:$0xff]  ;;  %v33_v15 = vld [vmem:[%s199_s2] sm:$0xff] }
   0x5   :  { %142 = vmatprep.subr.bf16.mxu0 %v141_v5 }
   0x6   :  { %22 = vperm.xlu0 %147, %v15_v4   ;;  %144 = vmatpush3.bf16.msra.mxu0 %v141_v5 }
   0x7   :  { %136 = vmatprep.subr.mxu0 %v32_v6 }
   0xa   :  { %137 = vmatpush3.msra.mxu0 %v32_v6 }
  0x81   :  { %v20_v9 = vpop.permute.xlu0 %19 }
  0x82   :  { %vm24_vm1 = vcmp.eq.s32.totalorder %v17_v8, %v20_v9 }
  0x83   :  { %v123_v11 = vsel %vm24_vm1, 1.0, %v149_v10 }
  0x84   :  { %138 = vmatprep.mubr.msk.f32.mxu0 %vm35_vm0, %v123_v11 }
  0x85   :  { %v23_v12 = vpop.permute.xlu0 %22 }
  0x86   :  { %vm25_vm2 = vcmp.eq.s32.totalorder %v17_v8, %v23_v12 }
  0x87   :  { %v124_v13 = vsel %vm25_vm2, 1.0, %v149_v10 }
  0x88   :  { %139 = vmatmul.mubr.msk.f32.vlgmr.msra.gmra.mrb[0].mxu0 %vm35_vm0, %v124_v13 }
 0x15b   :  { %v140_v16 = vpop.f32.mrb[0].mxu0 }
 0x15c   :  { %v114_v17 = vadd.f32 %v140_v16, %v34_v14  ;;  %v108_v18 = vpop.f32.mrb[1].mxu0 }
 0x15d   :  { %v109_v19 = vadd.f32 %v108_v18, %v33_v15 }
 0x15e   :  { %118 = vst [vmem:[%s200_s3 + $0x8] sm:$0xff] %v114_v17 }
 0x15f   :  { %117 = vst [vmem:[%s200_s3] sm:$0xff] %v109_v19 }

</bundles_post_ra>
